<compile_context>
chip_gen: v7x
topology: tpu7x:2x2x1
jax: 0.10.0
libtpu: 0.0.40
codegen_flags: <defaults>
</compile_context>

<pallas_src>
import functools
import math

import jax
import jax.numpy as jnp
from jax import lax
from jax.experimental import pallas as pl
from jax.experimental.pallas import tpu as pltpu


def _mha_kernel(xq_ref, xk_ref, xv_ref,
                wq_ref, wk_ref, wv_ref, wc_ref,
                out_ref, *, n_head):
    """One grid step = one batch element.

    xq/xk/xv_ref : [1, L, D] bf16   full-sequence activations for this batch
    wq/wk/wv_ref : [D, D]    bf16   W.T of the projections (y = x @ W.T)
    wc_ref       : [D, D]    bf16   W.T of the output projection
    out_ref      : [1, L, D] f32
    """
    xq = xq_ref[0]            # [L, D] bf16
    xk = xk_ref[0]
    xv = xv_ref[0]
    wq = wq_ref[...]          # [D, D] bf16
    wk = wk_ref[...]
    wv = wv_ref[...]
    wc = wc_ref[...]

    # Full lane-dense projections (bf16 MXU, f32 accumulation).
    q_all = jnp.dot(xq, wq, preferred_element_type=jnp.float32).astype(jnp.bfloat16)
    k_all = jnp.dot(xk, wk, preferred_element_type=jnp.float32).astype(jnp.bfloat16)
    v_all = jnp.dot(xv, wv, preferred_element_type=jnp.float32).astype(jnp.bfloat16)

    L, D = q_all.shape
    dt = D // n_head
    inv_sqrt_dt = 1.0 / math.sqrt(float(dt))

    ctx_heads = []
    for h in range(n_head):            # static unroll over heads
        lo, hi = h * dt, (h + 1) * dt
        qh = q_all[:, lo:hi]           # [L, dt]
        kh = k_all[:, lo:hi]
        vh = v_all[:, lo:hi]

        # score = softmax(Q K^T / sqrt(dt)); contract last dims directly
        # (no explicit transpose of K), f32 softmax math.
        score = lax.dot_general(
            qh, kh, (((1,), (1,)), ((), ())),
            preferred_element_type=jnp.float32) * inv_sqrt_dt      # [L, L] f32
        score = score - jnp.max(score, axis=-1, keepdims=True)
        p = jnp.exp(score)
        p = p * pl.reciprocal(jnp.sum(p, axis=-1, keepdims=True), approx=True)

        # context = score @ V  (bf16 MXU, f32 accumulation)
        ctx = jnp.dot(p.astype(jnp.bfloat16), vh,
                      preferred_element_type=jnp.float32)          # [L, dt] f32
        ctx_heads.append(ctx)

    # concat(heads) then one lane-dense output projection, written straight
    # into the output block (no extra accumulator scratch).
    ctx_full = jnp.concatenate(ctx_heads, axis=-1).astype(jnp.bfloat16)  # [L, D]
    out_ref[0] = jnp.dot(ctx_full, wc,
                         preferred_element_type=jnp.float32).astype(out_ref.dtype)


def multi_head_attention(q, k, v, w_q, w_k, w_v, w_concat, n_head):
    """q, k, v: [B, L, D] f32. w_*: [D, D] PyTorch nn.Linear weights (out, in)."""
    B, L, D = q.shape
    assert D % n_head == 0

    # bf16 matmul inputs (halves HBM traffic / VMEM footprint; MXU is bf16-native).
    qb = q.astype(jnp.bfloat16)
    kb = k.astype(jnp.bfloat16)
    vb = v.astype(jnp.bfloat16)
    # PyTorch Linear computes y = x @ W.T, so pass W.T directly.
    wqT = w_q.T.astype(jnp.bfloat16)
    wkT = w_k.T.astype(jnp.bfloat16)
    wvT = w_v.T.astype(jnp.bfloat16)
    wcT = w_concat.T.astype(jnp.bfloat16)

    act_spec = pl.BlockSpec((1, L, D), lambda b: (b, 0, 0))
    w_spec = pl.BlockSpec((D, D), lambda b: (0, 0))     # constant -> VMEM-resident
    out_spec = pl.BlockSpec((1, L, D), lambda b: (b, 0, 0))

    return pl.pallas_call(
        functools.partial(_mha_kernel, n_head=n_head),
        out_shape=jax.ShapeDtypeStruct((B, L, D), q.dtype),
        grid=(B,),
        in_specs=[act_spec, act_spec, act_spec,
                  w_spec, w_spec, w_spec, w_spec],
        out_specs=out_spec,
        compiler_params=pltpu.CompilerParams(
            dimension_semantics=("parallel",)),
    )(qb, kb, vb, wqT, wkT, wvT, wcT)


def _reference_mha(q, k, v, w_q, w_k, w_v, w_concat, n_head):
    """Pure-JAX (f32) replica of the PyTorch module for verification."""
    B, L, D = q.shape
    dt = D // n_head

    def lin(x, w):
        return x @ w.T

    def split(t):  # [B, L, D] -> [B, H, L, dt]
        return jnp.transpose(t.reshape(B, L, n_head, dt), (0, 2, 1, 3))

    qh, kh, vh = split(lin(q, w_q)), split(lin(k, w_k)), split(lin(v, w_v))
    score = jnp.einsum("bhld,bhmd->bhlm", qh, kh) / math.sqrt(dt)
    score = jax.nn.softmax(score, axis=-1)
    ctx = jnp.einsum("bhlm,bhmd->bhld", score, vh)
    ctx = jnp.transpose(ctx, (0, 2, 1, 3)).reshape(B, L, D)
    return lin(ctx, w_concat)


if __name__ == "__main__":
    B, L, D, H = 2, 8, 32, 4

    key = jax.random.PRNGKey(0)
    kq, kk, kv, kwq, kwk, kwv, kwc = jax.random.split(key, 7)

    q = jax.random.normal(kq, (B, L, D), dtype=jnp.float32)
    k = jax.random.normal(kk, (B, L, D), dtype=jnp.float32)
    v = jax.random.normal(kv, (B, L, D), dtype=jnp.float32)

    # Deterministic "nn.Linear(d_model, d_model, bias=False)" weights, shape (out, in).
    bound = 1.0 / math.sqrt(D)
    w_q = jax.random.uniform(kwq, (D, D), jnp.float32, -bound, bound)
    w_k = jax.random.uniform(kwk, (D, D), jnp.float32, -bound, bound)
    w_v = jax.random.uniform(kwv, (D, D), jnp.float32, -bound, bound)
    w_c = jax.random.uniform(kwc, (D, D), jnp.float32, -bound, bound)

    out = multi_head_attention(q, k, v, w_q, w_k, w_v, w_c, H)
    out = jax.block_until_ready(out)

    ref = _reference_mha(q, k, v, w_q, w_k, w_v, w_c, H)
    assert out.shape == (B, L, D)
    # bf16 MXU inputs + approx reciprocal -> tolerance looser than pure f32.
    assert jnp.allclose(out, ref, atol=2e-2, rtol=2e-2), "mismatch vs reference"

    print("KERNEL_OK")
</pallas_src>

<mosaic_0001>
module attributes {stable_mosaic.version = 11 : i64} {
  func.func @_mha_kernel(%arg0: i32, %arg1: memref<1x8x32xbf16, #tpu.memory_space<vmem>>, %arg2: memref<1x8x32xbf16, #tpu.memory_space<vmem>>, %arg3: memref<1x8x32xbf16, #tpu.memory_space<vmem>>, %arg4: memref<32x32xbf16, #tpu.memory_space<vmem>>, %arg5: memref<32x32xbf16, #tpu.memory_space<vmem>>, %arg6: memref<32x32xbf16, #tpu.memory_space<vmem>>, %arg7: memref<32x32xbf16, #tpu.memory_space<vmem>>, %arg8: memref<1x8x32xf32, #tpu.memory_space<vmem>>) attributes {dimension_semantics = [#tpu.dimension_semantics<parallel>], iteration_bounds = array<i64: 2>, scalar_prefetch = 0 : i64, scratch_operands = 0 : i64, tpu.core_type = #tpu.core_type<tc>, window_params = [{transform_indices = @transform_0, window_bounds = array<i64: 1, 8, 32>}, {transform_indices = @transform_1, window_bounds = array<i64: 1, 8, 32>}, {transform_indices = @transform_2, window_bounds = array<i64: 1, 8, 32>}, {pipeline_mode = #tpu.pipeline_mode<synchronous>, transform_indices = @transform_3, window_bounds = array<i64: 32, 32>}, {pipeline_mode = #tpu.pipeline_mode<synchronous>, transform_indices = @transform_4, window_bounds = array<i64: 32, 32>}, {pipeline_mode = #tpu.pipeline_mode<synchronous>, transform_indices = @transform_5, window_bounds = array<i64: 32, 32>}, {pipeline_mode = #tpu.pipeline_mode<synchronous>, transform_indices = @transform_6, window_bounds = array<i64: 32, 32>}, {transform_indices = @transform_7, window_bounds = array<i64: 1, 8, 32>}]} {
    %c0 = arith.constant 0 : index
    %c0_0 = arith.constant 0 : index
    %c0_1 = arith.constant 0 : index
    %0 = vector.load %arg1[%c0, %c0_0, %c0_1] : memref<1x8x32xbf16, #tpu.memory_space<vmem>>, vector<1x8x32xbf16>
    %1 = vector.shape_cast %0 : vector<1x8x32xbf16> to vector<8x32xbf16>
    %c0_2 = arith.constant 0 : index
    %c0_3 = arith.constant 0 : index
    %c0_4 = arith.constant 0 : index
    %2 = vector.load %arg2[%c0_2, %c0_3, %c0_4] : memref<1x8x32xbf16, #tpu.memory_space<vmem>>, vector<1x8x32xbf16>
    %3 = vector.shape_cast %2 : vector<1x8x32xbf16> to vector<8x32xbf16>
    %c0_5 = arith.constant 0 : index
    %c0_6 = arith.constant 0 : index
    %c0_7 = arith.constant 0 : index
    %4 = vector.load %arg3[%c0_5, %c0_6, %c0_7] : memref<1x8x32xbf16, #tpu.memory_space<vmem>>, vector<1x8x32xbf16>
    %5 = vector.shape_cast %4 : vector<1x8x32xbf16> to vector<8x32xbf16>
    %c0_8 = arith.constant 0 : index
    %c0_9 = arith.constant 0 : index
    %6 = vector.load %arg4[%c0_8, %c0_9] : memref<32x32xbf16, #tpu.memory_space<vmem>>, vector<32x32xbf16>
    %c0_10 = arith.constant 0 : index
    %c0_11 = arith.constant 0 : index
    %7 = vector.load %arg5[%c0_10, %c0_11] : memref<32x32xbf16, #tpu.memory_space<vmem>>, vector<32x32xbf16>
    %c0_12 = arith.constant 0 : index
    %c0_13 = arith.constant 0 : index
    %8 = vector.load %arg6[%c0_12, %c0_13] : memref<32x32xbf16, #tpu.memory_space<vmem>>, vector<32x32xbf16>
    %c0_14 = arith.constant 0 : index
    %c0_15 = arith.constant 0 : index
    %9 = vector.load %arg7[%c0_14, %c0_15] : memref<32x32xbf16, #tpu.memory_space<vmem>>, vector<32x32xbf16>
    %cst = arith.constant dense<0.000000e+00> : vector<8x32xf32>
    %10 = tpu.matmul %1, %6, %cst {dimension_numbers = #tpu.dot_dimension_numbers<[1], [0], [0], [1], [0, 0, 1, 1], [], []>} : vector<8x32xbf16>, vector<32x32xbf16>, vector<8x32xf32> -> vector<8x32xf32>
    %11 = arith.truncf %10 : vector<8x32xf32> to vector<8x32xbf16>
    %cst_16 = arith.constant dense<0.000000e+00> : vector<8x32xf32>
    %12 = tpu.matmul %3, %7, %cst_16 {dimension_numbers = #tpu.dot_dimension_numbers<[1], [0], [0], [1], [0, 0, 1, 1], [], []>} : vector<8x32xbf16>, vector<32x32xbf16>, vector<8x32xf32> -> vector<8x32xf32>
    %13 = arith.truncf %12 : vector<8x32xf32> to vector<8x32xbf16>
    %cst_17 = arith.constant dense<0.000000e+00> : vector<8x32xf32>
    %14 = tpu.matmul %5, %8, %cst_17 {dimension_numbers = #tpu.dot_dimension_numbers<[1], [0], [0], [1], [0, 0, 1, 1], [], []>} : vector<8x32xbf16>, vector<32x32xbf16>, vector<8x32xf32> -> vector<8x32xf32>
    %15 = arith.truncf %14 : vector<8x32xf32> to vector<8x32xbf16>
    %16 = vector.extract_strided_slice %11 {offsets = [0, 0], sizes = [8, 8], strides = [1, 1]} : vector<8x32xbf16> to vector<8x8xbf16>
    %17 = vector.extract_strided_slice %13 {offsets = [0, 0], sizes = [8, 8], strides = [1, 1]} : vector<8x32xbf16> to vector<8x8xbf16>
    %18 = vector.extract_strided_slice %15 {offsets = [0, 0], sizes = [8, 8], strides = [1, 1]} : vector<8x32xbf16> to vector<8x8xbf16>
    %cst_18 = arith.constant dense<0.000000e+00> : vector<8x8xf32>
    %19 = tpu.matmul %16, %17, %cst_18 {dimension_numbers = #tpu.dot_dimension_numbers<[1], [1], [0], [0], [0, 0, 1, 0], [], []>} : vector<8x8xbf16>, vector<8x8xbf16>, vector<8x8xf32> -> vector<8x8xf32>
    %cst_19 = arith.constant 0.353553385 : f32
    %20 = vector.broadcast %cst_19 : f32 to vector<8x8xf32>
    %21 = arith.mulf %19, %20 : vector<8x8xf32>
    %cst_20 = arith.constant dense<0xFF800000> : vector<8xf32>
    %22 = vector.multi_reduction <maximumf>, %21, %cst_20 [1] : vector<8x8xf32> to vector<8xf32>
    %23 = vector.shape_cast %22 : vector<8xf32> to vector<8x1xf32>
    %24 = vector.broadcast %23 : vector<8x1xf32> to vector<8x8xf32>
    %25 = arith.subf %21, %24 : vector<8x8xf32>
    %26 = math.exp %25 : vector<8x8xf32>
    %cst_21 = arith.constant dense<0.000000e+00> : vector<8xf32>
    %27 = vector.multi_reduction <add>, %26, %cst_21 [1] : vector<8x8xf32> to vector<8xf32>
    %28 = vector.shape_cast %27 : vector<8xf32> to vector<8x1xf32>
    %29 = tpu.reciprocal %28 {approx = true} : vector<8x1xf32> -> vector<8x1xf32>
    %30 = vector.broadcast %29 : vector<8x1xf32> to vector<8x8xf32>
    %31 = arith.mulf %26, %30 : vector<8x8xf32>
    %32 = arith.truncf %31 : vector<8x8xf32> to vector<8x8xbf16>
    %cst_22 = arith.constant dense<0.000000e+00> : vector<8x8xf32>
    %33 = tpu.matmul %32, %18, %cst_22 {dimension_numbers = #tpu.dot_dimension_numbers<[1], [0], [0], [1], [0, 0, 1, 1], [], []>} : vector<8x8xbf16>, vector<8x8xbf16>, vector<8x8xf32> -> vector<8x8xf32>
    %34 = vector.extract_strided_slice %11 {offsets = [0, 8], sizes = [8, 8], strides = [1, 1]} : vector<8x32xbf16> to vector<8x8xbf16>
    %35 = vector.extract_strided_slice %13 {offsets = [0, 8], sizes = [8, 8], strides = [1, 1]} : vector<8x32xbf16> to vector<8x8xbf16>
    %36 = vector.extract_strided_slice %15 {offsets = [0, 8], sizes = [8, 8], strides = [1, 1]} : vector<8x32xbf16> to vector<8x8xbf16>
    %cst_23 = arith.constant dense<0.000000e+00> : vector<8x8xf32>
    %37 = tpu.matmul %34, %35, %cst_23 {dimension_numbers = #tpu.dot_dimension_numbers<[1], [1], [0], [0], [0, 0, 1, 0], [], []>} : vector<8x8xbf16>, vector<8x8xbf16>, vector<8x8xf32> -> vector<8x8xf32>
    %cst_24 = arith.constant 0.353553385 : f32
    %38 = vector.broadcast %cst_24 : f32 to vector<8x8xf32>
    %39 = arith.mulf %37, %38 : vector<8x8xf32>
    %cst_25 = arith.constant dense<0xFF800000> : vector<8xf32>
    %40 = vector.multi_reduction <maximumf>, %39, %cst_25 [1] : vector<8x8xf32> to vector<8xf32>
    %41 = vector.shape_cast %40 : vector<8xf32> to vector<8x1xf32>
    %42 = vector.broadcast %41 : vector<8x1xf32> to vector<8x8xf32>
    %43 = arith.subf %39, %42 : vector<8x8xf32>
    %44 = math.exp %43 : vector<8x8xf32>
    %cst_26 = arith.constant dense<0.000000e+00> : vector<8xf32>
    %45 = vector.multi_reduction <add>, %44, %cst_26 [1] : vector<8x8xf32> to vector<8xf32>
    %46 = vector.shape_cast %45 : vector<8xf32> to vector<8x1xf32>
    %47 = tpu.reciprocal %46 {approx = true} : vector<8x1xf32> -> vector<8x1xf32>
    %48 = vector.broadcast %47 : vector<8x1xf32> to vector<8x8xf32>
    %49 = arith.mulf %44, %48 : vector<8x8xf32>
    %50 = arith.truncf %49 : vector<8x8xf32> to vector<8x8xbf16>
    %cst_27 = arith.constant dense<0.000000e+00> : vector<8x8xf32>
    %51 = tpu.matmul %50, %36, %cst_27 {dimension_numbers = #tpu.dot_dimension_numbers<[1], [0], [0], [1], [0, 0, 1, 1], [], []>} : vector<8x8xbf16>, vector<8x8xbf16>, vector<8x8xf32> -> vector<8x8xf32>
    %52 = vector.extract_strided_slice %11 {offsets = [0, 16], sizes = [8, 8], strides = [1, 1]} : vector<8x32xbf16> to vector<8x8xbf16>
    %53 = vector.extract_strided_slice %13 {offsets = [0, 16], sizes = [8, 8], strides = [1, 1]} : vector<8x32xbf16> to vector<8x8xbf16>
    %54 = vector.extract_strided_slice %15 {offsets = [0, 16], sizes = [8, 8], strides = [1, 1]} : vector<8x32xbf16> to vector<8x8xbf16>
    %cst_28 = arith.constant dense<0.000000e+00> : vector<8x8xf32>
    %55 = tpu.matmul %52, %53, %cst_28 {dimension_numbers = #tpu.dot_dimension_numbers<[1], [1], [0], [0], [0, 0, 1, 0], [], []>} : vector<8x8xbf16>, vector<8x8xbf16>, vector<8x8xf32> -> vector<8x8xf32>
    %cst_29 = arith.constant 0.353553385 : f32
    %56 = vector.broadcast %cst_29 : f32 to vector<8x8xf32>
    %57 = arith.mulf %55, %56 : vector<8x8xf32>
    %cst_30 = arith.constant dense<0xFF800000> : vector<8xf32>
    %58 = vector.multi_reduction <maximumf>, %57, %cst_30 [1] : vector<8x8xf32> to vector<8xf32>
    %59 = vector.shape_cast %58 : vector<8xf32> to vector<8x1xf32>
    %60 = vector.broadcast %59 : vector<8x1xf32> to vector<8x8xf32>
    %61 = arith.subf %57, %60 : vector<8x8xf32>
    %62 = math.exp %61 : vector<8x8xf32>
    %cst_31 = arith.constant dense<0.000000e+00> : vector<8xf32>
    %63 = vector.multi_reduction <add>, %62, %cst_31 [1] : vector<8x8xf32> to vector<8xf32>
    %64 = vector.shape_cast %63 : vector<8xf32> to vector<8x1xf32>
    %65 = tpu.reciprocal %64 {approx = true} : vector<8x1xf32> -> vector<8x1xf32>
    %66 = vector.broadcast %65 : vector<8x1xf32> to vector<8x8xf32>
    %67 = arith.mulf %62, %66 : vector<8x8xf32>
    %68 = arith.truncf %67 : vector<8x8xf32> to vector<8x8xbf16>
    %cst_32 = arith.constant dense<0.000000e+00> : vector<8x8xf32>
    %69 = tpu.matmul %68, %54, %cst_32 {dimension_numbers = #tpu.dot_dimension_numbers<[1], [0], [0], [1], [0, 0, 1, 1], [], []>} : vector<8x8xbf16>, vector<8x8xbf16>, vector<8x8xf32> -> vector<8x8xf32>
    %70 = vector.extract_strided_slice %11 {offsets = [0, 24], sizes = [8, 8], strides = [1, 1]} : vector<8x32xbf16> to vector<8x8xbf16>
    %71 = vector.extract_strided_slice %13 {offsets = [0, 24], sizes = [8, 8], strides = [1, 1]} : vector<8x32xbf16> to vector<8x8xbf16>
    %72 = vector.extract_strided_slice %15 {offsets = [0, 24], sizes = [8, 8], strides = [1, 1]} : vector<8x32xbf16> to vector<8x8xbf16>
    %cst_33 = arith.constant dense<0.000000e+00> : vector<8x8xf32>
    %73 = tpu.matmul %70, %71, %cst_33 {dimension_numbers = #tpu.dot_dimension_numbers<[1], [1], [0], [0], [0, 0, 1, 0], [], []>} : vector<8x8xbf16>, vector<8x8xbf16>, vector<8x8xf32> -> vector<8x8xf32>
    %cst_34 = arith.constant 0.353553385 : f32
    %74 = vector.broadcast %cst_34 : f32 to vector<8x8xf32>
    %75 = arith.mulf %73, %74 : vector<8x8xf32>
    %cst_35 = arith.constant dense<0xFF800000> : vector<8xf32>
    %76 = vector.multi_reduction <maximumf>, %75, %cst_35 [1] : vector<8x8xf32> to vector<8xf32>
    %77 = vector.shape_cast %76 : vector<8xf32> to vector<8x1xf32>
    %78 = vector.broadcast %77 : vector<8x1xf32> to vector<8x8xf32>
    %79 = arith.subf %75, %78 : vector<8x8xf32>
    %80 = math.exp %79 : vector<8x8xf32>
    %cst_36 = arith.constant dense<0.000000e+00> : vector<8xf32>
    %81 = vector.multi_reduction <add>, %80, %cst_36 [1] : vector<8x8xf32> to vector<8xf32>
    %82 = vector.shape_cast %81 : vector<8xf32> to vector<8x1xf32>
    %83 = tpu.reciprocal %82 {approx = true} : vector<8x1xf32> -> vector<8x1xf32>
    %84 = vector.broadcast %83 : vector<8x1xf32> to vector<8x8xf32>
    %85 = arith.mulf %80, %84 : vector<8x8xf32>
    %86 = arith.truncf %85 : vector<8x8xf32> to vector<8x8xbf16>
    %cst_37 = arith.constant dense<0.000000e+00> : vector<8x8xf32>
    %87 = tpu.matmul %86, %72, %cst_37 {dimension_numbers = #tpu.dot_dimension_numbers<[1], [0], [0], [1], [0, 0, 1, 1], [], []>} : vector<8x8xbf16>, vector<8x8xbf16>, vector<8x8xf32> -> vector<8x8xf32>
    %88 = tpu.concatenate %33, %51, %69, %87 in 1 : vector<8x8xf32>, vector<8x8xf32>, vector<8x8xf32>, vector<8x8xf32> -> vector<8x32xf32>
    %89 = arith.truncf %88 : vector<8x32xf32> to vector<8x32xbf16>
    %cst_38 = arith.constant dense<0.000000e+00> : vector<8x32xf32>
    %90 = tpu.matmul %89, %9, %cst_38 {dimension_numbers = #tpu.dot_dimension_numbers<[1], [0], [0], [1], [0, 0, 1, 1], [], []>} : vector<8x32xbf16>, vector<32x32xbf16>, vector<8x32xf32> -> vector<8x32xf32>
    %c0_39 = arith.constant 0 : index
    %c0_40 = arith.constant 0 : index
    %c0_41 = arith.constant 0 : index
    %91 = vector.load %arg8[%c0_39, %c0_40, %c0_41] : memref<1x8x32xf32, #tpu.memory_space<vmem>>, vector<1x8x32xf32>
    %92 = vector.shape_cast %91 : vector<1x8x32xf32> to vector<8x32xf32>
    %93 = vector.shape_cast %90 : vector<8x32xf32> to vector<1x8x32xf32>
    tpu.vector_store %arg8[%c0_39, %c0_40, %c0_41], %93 {strides = array<i32>} : memref<1x8x32xf32, #tpu.memory_space<vmem>>, vector<1x8x32xf32>,
    return
  }
  func.func @transform_0(%arg0: i32) -> (i32, i32, i32) {
    %c0_i32 = arith.constant 0 : i32
    %c0_i32_0 = arith.constant 0 : i32
    %c0_i32_1 = arith.constant 0 : i32
    return %arg0, %c0_i32, %c0_i32_0 : i32, i32, i32
  }
  func.func @transform_1(%arg0: i32) -> (i32, i32, i32) {
    %c0_i32 = arith.constant 0 : i32
    %c0_i32_0 = arith.constant 0 : i32
    %c0_i32_1 = arith.constant 0 : i32
    return %arg0, %c0_i32, %c0_i32_0 : i32, i32, i32
  }
  func.func @transform_2(%arg0: i32) -> (i32, i32, i32) {
    %c0_i32 = arith.constant 0 : i32
    %c0_i32_0 = arith.constant 0 : i32
    %c0_i32_1 = arith.constant 0 : i32
    return %arg0, %c0_i32, %c0_i32_0 : i32, i32, i32
  }
  func.func @transform_3(%arg0: i32) -> (i32, i32) {
    %c0_i32 = arith.constant 0 : i32
    %c0_i32_0 = arith.constant 0 : i32
    %c0_i32_1 = arith.constant 0 : i32
    return %c0_i32, %c0_i32_0 : i32, i32
  }
  func.func @transform_4(%arg0: i32) -> (i32, i32) {
    %c0_i32 = arith.constant 0 : i32
    %c0_i32_0 = arith.constant 0 : i32
    %c0_i32_1 = arith.constant 0 : i32
    return %c0_i32, %c0_i32_0 : i32, i32
  }
  func.func @transform_5(%arg0: i32) -> (i32, i32) {
    %c0_i32 = arith.constant 0 : i32
    %c0_i32_0 = arith.constant 0 : i32
    %c0_i32_1 = arith.constant 0 : i32
    return %c0_i32, %c0_i32_0 : i32, i32
  }
  func.func @transform_6(%arg0: i32) -> (i32, i32) {
    %c0_i32 = arith.constant 0 : i32
    %c0_i32_0 = arith.constant 0 : i32
    %c0_i32_1 = arith.constant 0 : i32
    return %c0_i32, %c0_i32_0 : i32, i32
  }
  func.func @transform_7(%arg0: i32) -> (i32, i32, i32) {
    %c0_i32 = arith.constant 0 : i32
    %c0_i32_0 = arith.constant 0 : i32
    %c0_i32_1 = arith.constant 0 : i32
    return %arg0, %c0_i32, %c0_i32_0 : i32, i32, i32
  }
}

</mosaic_0001>

<bundles_post_ra>
// kernel: tpu_custom_call.1
= control target key start
LH: loop header
LB: loop body
LE: loop exit
PB: predicated region body
PF: predicated region fallthrough
CT: control target
= control target key end

     0   :  { %s2279_s0 = inlined_call_operand.hbm [shape: bf16[2,8,32], index: 0, kind: input, shape index: {}]   ;;  %s2280_s1 = inlined_call_operand.hbm [shape: bf16[2,8,32], index: 1, kind: input, shape index: {}]   ;;  %s2281_s2 = inlined_call_operand.hbm [shape: bf16[2,8,32], index: 2, kind: input, shape index: {}]   ;;  %s2282_s3 = inlined_call_operand.hbm [shape: bf16[32,32], index: 3, kind: input, shape index: {}]   ;;  %s2283_s4 = inlined_call_operand.hbm [shape: bf16[32,32], index: 4, kind: input, shape index: {}]   ;;  %s2284_s5 = inlined_call_operand.vmem [shape: bf16[32,32], index: 5, kind: input, shape index: {}]   ;;  %s2285_s6 = inlined_call_operand.hbm [shape: bf16[32,32], index: 6, kind: input, shape index: {}]   ;;  %s2286_s7 = inlined_call_operand.hbm [shape: f32[2,8,32], index: 7, kind: output, shape index: {}]  }
   0x1   :  { %2310 = sst [smem:[#allocation24_spill]] %s2280_s1 }
   0x2   :  { %2311 = sst [smem:[#allocation25_spill]] %s2282_s3 }
   0x3   :  { %2312 = sst [smem:[#allocation26_spill]] %s2286_s7 }
   0x4   :  { %12 = vsyncpa [#allocation3], 0 }
   0x5   :  { %14 = vsyncpa [#allocation3 + $0x1], 0 }
   0x6   :  { %15 = vsyncpa [#allocation6], 0 }
   0x7   :  { %17 = vsyncpa [#allocation6 + $0x1], 0 }
   0x8   :  { %18 = vsyncpa [#allocation9], 0 }
   0x9   :  { %19 = vsyncpa [#allocation12], 0 }
   0xa   :  { %20 = vsyncpa [#allocation4], 0 }
   0xb   :  { %22 = vsyncpa [#allocation4 + $0x1], 0  ;;  %s1855_s24 = smov 0   ;;  %s1857_s25 = smov 0  }
   0xc   :  { %s1859_s26 = smov 0   ;;  %s1861_s27 = smov 0  }
   0xd LB: > { %2313 = sst [smem:[#allocation19_spill]] %s1784_s24  ;;  %s1876_s28 = sadd.s32 4294967295, %s1796_s27   ;;  %s1796_s27 = sphi %s1861_s27, %s2350_s27   ;;  %s1792_s26 = sphi %s1859_s26, %s2354_s26   ;;  %s1788_s25 = sphi %s1857_s25, %s2353_s25   ;;  %s1784_s24 = sphi %s1855_s24, %s2352_s24  }
   0xe   : > { %2314 = sst [smem:[#allocation20_spill]] %s1796_s27  ;;  %s1271_s29 = sadd.s32 4294967294, %s1796_s27  }
   0xf   : > { %p48_p0 = scmp.ne.s32.totalorder %s1788_s25, %s1784_s24  ;;  %p2287_p1 = scmp.eq.s32.totalorder %s1876_s28, 0 }
  0x10   : > { %p214_p3 = scmp.eq.s32.totalorder %s1271_s29, 1  ;;  %p1272_p5 = scmp.ge.s32.totalorder %s1796_s27, 1 }
  0x11   : > { %p1885_p4 = por %p2287_p1, %p48_p0  ;;  %p221_p7 = scmp.lt.s32.totalorder %s1796_s27, 3 }
  0x12   : > { %p1890_p6 = por %p214_p3, %p48_p0  ;;  %s1798_s10 = smov [#allocation8]  }
  0x13   : > { %s2315_s30 = scalar_select %p1885_p4, 1, 0 }
  0x14   : > { %s2316_s8 = scalar_select %p1890_p6, 1, 0 }
  0x15   : > { %p1895_p8 = pnand %p1272_p5, %p221_p7  ;;  %s233_s11 = sshll.u32 %s1798_s10, 4  ;;  %s1899_s11 = int_to_ptr.vmem [resolvable:$true] %s233_s11 }
  0x16   : > { %2317 = sst [smem:[#allocation21_spill]] %s2316_s8  ;;  %s1911_s13 = sadd.s32 1, %s1796_s27  }
  0x17   : > { %s2318_s9 = scalar_select %p1895_p8, 1, 0 }
  0x18   : > { %p1443_p9 = pneg %p1895_p8  ;;  %2320 = sst [smem:[#allocation22_spill]] %s1911_s13 }
  0x19   : > { %s35_s14 = sadd.s32 1, %s1792_s26  ;;  %s32_s15 = ssub.s32 %s1796_s27, %s1911_s13 }
  0x1a   : > { %p1906_p11 = pnand %p1443_p9, %p2287_p1  ;;  %s2321_s3 = sld [smem:[#allocation25_spill]] }
  0x1c   : > { %s2319_s12 = scalar_select %p1906_p11, 1, 0 }
  0x1d   : > { %p1924_p13 = pneg %p1906_p11 }
  0x1f   : > { %s2322_s21 = scalar_select %p1924_p13, 1, 0 }
  0x20   : > { %s1544_s18 = scalar_lea.hbm %s2321_s3, 256 }
  0x21   : > { %p1545_p12 = scmp.ne.s32.totalorder %s2321_s3, %s1544_s18  ;;  %p1551_p5 = scmp.lt.u32.totalorder %s1544_s18, %s2321_s3 }
  0x23   : > { %p1547_p0 = pnand %p1924_p13, %p1545_p12 }
  0x25   : > { %p1548_p3 = pneg %p1547_p0 }
  0x27   : > { %p1553_p7 = pnand %p1551_p5, %p1548_p3 }
  0x29   : > { %1556 = shalt.err (!%p1553_p7)
}
  0x2a   : > { %s1557_s29 = scalar_lea.vmem %s1899_s11, 256  ;;  %p1565_p2 = scmp.lt.s32.totalorder %s1899_s11, %s1899_s11 }
  0x2b   : > { %p1558_p9 = scmp.ne.s32.totalorder %s1899_s11, %s1557_s29  ;;  %p1566_p6 = scmp.lt.s32.totalorder %s1557_s29, %s1557_s29 }
  0x2d   : > { %p1560_p10 = pnand %p1558_p9, %p1924_p13  ;;  %p1567_p12 = por %p1566_p6, %p1565_p2 }
  0x2f   : > { %p1561_p1 = pneg %p1560_p10 }
  0x31   : > { %p1568_p0 = pnand %p1567_p12, %p1561_p1 }
  0x33   : > { %1571 = shalt.err (!%p1568_p0)
}
  0x34   : > { %s2288_s10 = smov 64   ;;  %s2290_s16 = smov 4  }
  0x35   : > { %1446 = dma.hbm_to_vmem [thread:$0]  (!%p1906_p11), %s2321_s3, 256, %s1899_s11, [#allocation9], %s2288_s10, %s2288_s10, %s2290_s16  }
  0x36   : > { %p33_p1 = scmp.eq.s32.totalorder %s32_s15, 0  ;;  %p42_p2 = scmp.ne.s32.totalorder %s1792_s26, %s1788_s25 }
  0x37   : > { %p43_p6 = scmp.eq.s32.totalorder %s1796_s27, 0  ;;  %p1470_p10 = scmp.lt.s32.totalorder %s1796_s27, 2 }
  0x38   : > { %s1953_s19 = scalar_select %p33_p1, %s1792_s26, %s35_s14  }
  0x39   : > { %p44_p3 = por %p43_p6, %p42_p2  ;;  %p2324_p5 = scmp.eq.s32.totalorder %s1876_s28, 1 }
  0x3a   : > { %2323 = sst [smem:[#allocation23_spill]] %s1953_s19  ;;  %s2292_s22 = sand.u32 1, %s1792_s26  }
  0x3b   : > { %p1957_p7 = por %p2324_p5, %p42_p2  ;;  %s1963_s23 = sshll.u32 %s1796_s27, 6 }
  0x3c   : > { %s1967_s29 = sshll.u32 %s2292_s22, 2  ;;  %p1969_p9 = pnand %p1470_p10, %p44_p3 }
  0x3d   : > { %s2325_s20 = scalar_select %p1957_p7, 1, 0 }
  0x3e   : > { %s2326_s11 = scalar_select %p1969_p9, 1, 0 }
  0x3f   : > { %s294_s14 = sand.u32 1, %s1796_s27   ;;  %s2327_s1 = sld [smem:[#allocation24_spill]] }
  0x40   : > { %s298_s10 = scalar_lea.vmem [#allocation5], %s1967_s29  ;;  %s1983_s22 = scalar_lea.sflag [#allocation6], %s294_s14 }
  0x41   : > { %s305_s16 = sshll.u32 %s298_s10, 4  ;;  %p1989_p0 = pneg %p1969_p9  ;;  %s1981_s16 = int_to_ptr.vmem [resolvable:$true] %s305_s16 }
  0x43   : > { %s2328_s19 = scalar_select %p1989_p0, 1, 0 }
  0x45   : > { %s1978_s18 = scalar_lea.hbm %s2327_s1, %s1963_s23  ;;  %s1577_s13 = scalar_lea.hbm %s2327_s1, 128 }
  0x46   : > { %s1572_s3 = scalar_lea.hbm %s1978_s18, 64  ;;  %p1578_p6 = scmp.lt.u32.totalorder %s1978_s18, %s2327_s1 }
  0x47   : > { %p1573_p12 = scmp.ne.s32.totalorder %s1978_s18, %s1572_s3  ;;  %p1579_p10 = scmp.lt.u32.totalorder %s1577_s13, %s1572_s3 }
  0x48   : > { %p1581_p5 = scmp.lt.u32.totalorder %s1572_s3, %s1978_s18 }
  0x49   : > { %p1575_p1 = pnand %p1989_p0, %p1573_p12  ;;  %p1580_p3 = por %p1579_p10, %p1578_p6 }
  0x4b   : > { %p1576_p2 = pneg %p1575_p1  ;;  %p1582_p7 = por %p1581_p5, %p1580_p3 }
  0x4d   : > { %p1583_p4 = pnand %p1582_p7, %p1576_p2 }
  0x4f   : > { %1586 = shalt.err (!%p1583_p4)
}
  0x50   : > { %s1587_s14 = scalar_lea.vmem %s1981_s16, 64  ;;  %s1801_s15 = smov [#allocation5]  }
  0x51   : > { %p1588_p12 = scmp.ne.s32.totalorder %s1981_s16, %s1587_s14  ;;  %s1592_s17 = sshll.u32 %s1801_s15, 4  ;;  %s1593_s17 = int_to_ptr.vmem [resolvable:$false] %s1592_s17 }
  0x52   : > { %s1594_s27 = scalar_lea.vmem %s1593_s17, 128  ;;  %p1595_p11 = scmp.lt.s32.totalorder %s1981_s16, %s1593_s17 }
  0x53   : > { %p1590_p1 = pnand %p1588_p12, %p1989_p0  ;;  %p1596_p13 = scmp.lt.s32.totalorder %s1594_s27, %s1587_s14 }
  0x55   : > { %p1591_p8 = pneg %p1590_p1  ;;  %p1597_p6 = por %p1596_p13, %p1595_p11 }
  0x57   : > { %p1598_p10 = pnand %p1597_p6, %p1591_p8 }
  0x59   : > { %1601 = shalt.err (!%p1598_p10)
}
  0x5a   : > { %1459 = dma.hbm_to_vmem [thread:$0]  (!%p1969_p9), %s1978_s18, 64, %s1981_s16, %s1983_s22  }
  0x5b   : > { %s1802_s3 = smov [#allocation10]   ;;  %s1803_s10 = smov [#allocation11]  }
  0x5c   : > { %s246_s13 = sshll.u32 %s1802_s3, 4  ;;  %s262_s1 = sshll.u32 %s1803_s10, 4  ;;  %s247_s13 = int_to_ptr.vmem [resolvable:$true] %s246_s13  ;;  %s263_s1 = int_to_ptr.vmem [resolvable:$true] %s262_s1 }
  0x5d   : > { %s1602_s17 = scalar_lea.hbm %s2283_s4, 256  ;;  %p2329_p8 = scmp.ne.s32.totalorder %s2322_s21, 0 }
  0x5e   : > { %p1603_p4 = scmp.ne.s32.totalorder %s2283_s4, %s1602_s17  ;;  %p1609_p7 = scmp.lt.u32.totalorder %s1602_s17, %s2283_s4 }
  0x60   : > { %p1605_p11 = pnand %p1603_p4, %p2329_p8 }
  0x62   : > { %p1606_p13 = pneg %p1605_p11 }
  0x64   : > { %p1611_p2 = pnand %p1609_p7, %p1606_p13 }
  0x66   : > { %1614 = shalt.err (!%p1611_p2)
}
  0x67   : > { %s1615_s16 = scalar_lea.vmem %s247_s13, 256  ;;  %p1623_p1 = scmp.lt.s32.totalorder %s247_s13, %s247_s13 }
  0x68   : > { %p1616_p3 = scmp.ne.s32.totalorder %s247_s13, %s1615_s16  ;;  %p1624_p6 = scmp.lt.s32.totalorder %s1615_s16, %s1615_s16 }
  0x6a   : > { %p1618_p5 = pnand %p1616_p3, %p2329_p8  ;;  %p1625_p10 = por %p1624_p6, %p1623_p1 }
  0x6c   : > { %p1619_p12 = pneg %p1618_p5 }
  0x6e   : > { %p1626_p9 = pnand %p1625_p10, %p1619_p12 }
  0x70   : > { %1629 = shalt.err (!%p1626_p9)
}
  0x71   : > { %p2330_p4 = scmp.ne.s32.totalorder %s2319_s12, 0  ;;  %s2331_s8 = smov 4  }
  0x72   : > { %s2332_s18 = smov 64   ;;  %s1630_s15 = scalar_lea.hbm %s2285_s6, 256 }
  0x73   : > { %1449 = dma.hbm_to_vmem [thread:$0]  (!%p2330_p4), %s2283_s4, 256, %s247_s13, [#allocation9], %s2332_s18, %s2332_s18, %s2331_s8  }
  0x74   : > { %p1631_p11 = scmp.ne.s32.totalorder %s2285_s6, %s1630_s15  ;;  %p1637_p7 = scmp.lt.u32.totalorder %s1630_s15, %s2285_s6 }
  0x76   : > { %p1633_p9 = pnand %p1631_p11, %p2329_p8 }
  0x78   : > { %p1634_p13 = pneg %p1633_p9 }
  0x7a   : > { %p1639_p2 = pnand %p1637_p7, %p1634_p13 }
  0x7c   : > { %1642 = shalt.err (!%p1639_p2)
}
  0x7d   : > { %s1643_s7 = scalar_lea.vmem %s263_s1, 256  ;;  %p1651_p1 = scmp.lt.s32.totalorder %s263_s1, %s263_s1 }
  0x7e   : > { %p1644_p3 = scmp.ne.s32.totalorder %s263_s1, %s1643_s7  ;;  %p1652_p6 = scmp.lt.s32.totalorder %s1643_s7, %s1643_s7 }
  0x80   : > { %p1646_p5 = pnand %p1644_p3, %p2329_p8  ;;  %p1653_p10 = por %p1652_p6, %p1651_p1 }
  0x82   : > { %p1647_p12 = pneg %p1646_p5 }
  0x84   : > { %p1654_p0 = pnand %p1653_p10, %p1647_p12 }
  0x86   : > { %1657 = shalt.err (!%p1654_p0)
}
  0x87   : > { %1452 = dma.hbm_to_vmem [thread:$0]  (!%p2330_p4), %s2285_s6, 256, %s263_s1, [#allocation12], %s2332_s18, %s2332_s18, %s2331_s8  }
  0x88   : > { %s2059_s10 = scalar_lea.hbm %s2279_s0, %s1963_s23  ;;  %s280_s12 = scalar_lea.vmem [#allocation2], %s1967_s29 }
  0x89   : > { %s287_s15 = sshll.u32 %s280_s12, 4  ;;  %s2068_s27 = scalar_lea.hbm %s2281_s2, %s1963_s23  ;;  %s2062_s15 = int_to_ptr.vmem [resolvable:$true] %s287_s15 }
  0x8a   : > { %s2333_s16 = sand.u32 1, %s1792_s26   ;;  %s1658_s8 = scalar_lea.hbm %s2059_s10, 64 }
  0x8b   : > { %s277_s1 = scalar_lea.sflag [#allocation3], %s2333_s16  ;;  %p1659_p0 = scmp.ne.s32.totalorder %s2059_s10, %s1658_s8 }
  0x8c   : > { %p2334_p8 = scmp.ne.s32.totalorder %s2328_s19, 0  ;;  %s1663_s13 = scalar_lea.hbm %s2279_s0, 128 }
  0x8d   : > { %p1664_p9 = scmp.lt.u32.totalorder %s2059_s10, %s2279_s0  ;;  %p1665_p13 = scmp.lt.u32.totalorder %s1663_s13, %s1658_s8 }
  0x8e   : > { %p1661_p4 = pnand %p1659_p0, %p2334_p8  ;;  %p1667_p2 = scmp.lt.u32.totalorder %s1658_s8, %s2059_s10 }
  0x8f   : > { %p1666_p7 = por %p1665_p13, %p1664_p9 }
  0x90   : > { %p1662_p11 = pneg %p1661_p4 }
  0x91   : > { %p1668_p3 = por %p1667_p2, %p1666_p7 }
  0x93   : > { %p1669_p5 = pnand %p1668_p3, %p1662_p11 }
  0x95   : > { %1672 = shalt.err (!%p1669_p5)
}
  0x96   : > { %s1673_s23 = scalar_lea.vmem %s2062_s15, 64  ;;  %s1804_s3 = smov [#allocation2]  }
  0x97   : > { %p1674_p12 = scmp.ne.s32.totalorder %s2062_s15, %s1673_s23  ;;  %s1678_s12 = sshll.u32 %s1804_s3, 4  ;;  %s1679_s12 = int_to_ptr.vmem [resolvable:$false] %s1678_s12 }
  0x98   : > { %s1680_s17 = scalar_lea.vmem %s1679_s12, 128  ;;  %p1681_p10 = scmp.lt.s32.totalorder %s2062_s15, %s1679_s12 }
  0x99   : > { %p1676_p1 = pnand %p1674_p12, %p2334_p8  ;;  %p1682_p0 = scmp.lt.s32.totalorder %s1680_s17, %s1673_s23 }
  0x9b   : > { %p1677_p6 = pneg %p1676_p1  ;;  %p1683_p4 = por %p1682_p0, %p1681_p10 }
  0x9d   : > { %p1684_p9 = pnand %p1683_p4, %p1677_p6 }
  0x9f   : > { %1687 = shalt.err (!%p1684_p9)
}
  0xa0   : > { %p2335_p11 = scmp.ne.s32.totalorder %s2326_s11, 0  ;;  %s316_s14 = scalar_lea.vmem [#allocation7], %s1967_s29 }
  0xa1   : > { %s323_s16 = sshll.u32 %s316_s14, 4  ;;  %s1688_s8 = scalar_lea.hbm %s2068_s27, 64  ;;  %s324_s16 = int_to_ptr.vmem [resolvable:$true] %s323_s16 }
  0xa2   : > { %1456 = dma.hbm_to_vmem [thread:$0]  (!%p2335_p11), %s2059_s10, 64, %s2062_s15, %s277_s1  }
  0xa3   : > { %p1689_p13 = scmp.ne.s32.totalorder %s2068_s27, %s1688_s8  ;;  %s1693_s13 = scalar_lea.hbm %s2281_s2, 128 }
  0xa4   : > { %p1694_p3 = scmp.lt.u32.totalorder %s2068_s27, %s2281_s2  ;;  %p1695_p5 = scmp.lt.u32.totalorder %s1693_s13, %s1688_s8 }
  0xa5   : > { %p1691_p7 = pnand %p1689_p13, %p2334_p8  ;;  %p1697_p1 = scmp.lt.u32.totalorder %s1688_s8, %s2068_s27 }
  0xa6   : > { %p1696_p12 = por %p1695_p5, %p1694_p3 }
  0xa7   : > { %p1692_p2 = pneg %p1691_p7 }
  0xa8   : > { %p1698_p6 = por %p1697_p1, %p1696_p12 }
  0xaa   : > { %p1699_p10 = pnand %p1698_p6, %p1692_p2 }
  0xac   : > { %1702 = shalt.err (!%p1699_p10)
}
  0xad   : > { %s1703_s29 = scalar_lea.vmem %s324_s16, 64  ;;  %s1805_s10 = smov [#allocation7]  }
  0xae   : > { %p1704_p0 = scmp.ne.s32.totalorder %s324_s16, %s1703_s29  ;;  %s1708_s15 = sshll.u32 %s1805_s10, 4  ;;  %s1709_s15 = int_to_ptr.vmem [resolvable:$false] %s1708_s15 }
  0xaf   : > { %s1710_s1 = scalar_lea.vmem %s1709_s15, 128  ;;  %p1711_p13 = scmp.lt.s32.totalorder %s324_s16, %s1709_s15 }
  0xb0   : > { %p1706_p4 = pnand %p1704_p0, %p2334_p8  ;;  %p1712_p7 = scmp.lt.s32.totalorder %s1710_s1, %s1703_s29 }
  0xb2   : > { %p1707_p9 = pneg %p1706_p4  ;;  %p1713_p11 = por %p1712_p7, %p1711_p13 }
  0xb4   : > { %p1714_p3 = pnand %p1713_p11, %p1707_p9 }
  0xb6   : > { %1717 = shalt.err (!%p1714_p3)
}
  0xb7   : > { %p2336_p5 = scmp.ne.s32.totalorder %s2326_s11, 0  ;;  %p2337_p2 = scmp.ne.s32.totalorder %s2318_s9, 0 }
  0xb8   : > { %s2115_s19 = sand.u32 (!%p2337_p2), 1, %s1788_s25   ;;  %p2338_p8 = scmp.ne.s32.totalorder (!%p2337_p2), %s2315_s30, 0 }
  0xb9   : > { %1462 = dma.hbm_to_vmem [thread:$0]  (!%p2336_p5), %s2068_s27, 64, %s324_s16, %s1983_s22  }
  0xba   : > { %332 = sbr.rel (%p2337_p2) target bundleno = 1654 (0x676), region = 48  ;;  %s2118_s23 = sshll.u32 (!%p2337_p2), %s2115_s19, 2 }
  0xbb   : > { %s335_s3 = scalar_lea.sflag (!%p2337_p2), [#allocation3], %s2115_s19  ;;  %s338_s12 = scalar_lea.vmem (!%p2337_p2), [#allocation2], %s2118_s23 }
  0xc1   : > { %1763 = dma.done.wait (%p2338_p8), %s335_s3, 64  }
  0xc2   : > { %1765 = vsyncadd (%p2338_p8), %s335_s3, 4294967232  ;;  %s343_s9 = sand.u32 1, %s1876_s28   ;;  %s347_s11 = scalar_lea.vmem [#allocation5], %s2118_s23 }
  0xc3   : > { %s344_s22 = scalar_lea.sflag [#allocation6], %s343_s9 }
  0xc4   : > { %1767 = dma.done.wait (%p2338_p8), %s344_s22, 128  }
  0xc5   : > { %1769 = vsyncadd (%p2338_p8), %s344_s22, 4294967168  ;;  %s356_s27 = scalar_lea.vmem [#allocation7], %s2118_s23  ;;  %p2339_p11 = scmp.eq.s32.totalorder %s1876_s28, 0 }
  0xc7   : > { %1771 = dma.done.wait (%p2339_p11), [#allocation9], 512   ;;  %p2340_p12 = pmov %p2339_p11 }
  0xc8   : > { %p2341_p1 = pmov %p2339_p11 }
  0xc9   : > { %1773 = vsyncadd (%p2340_p12), [#allocation9], 4294966784 }
  0xca   : > { %1775 = dma.done.wait (%p2341_p1), [#allocation12], 256   ;;  %p2342_p6 = pmov %p2341_p1 }
  0xcb   : > { %v1806_v0 = vmov 0.0   ;;  %vm1807_vm0 = vmmov 0   ;;  %v1520_v1 = vld [vmem:[#allocation10] sm:$0xff]   ;;  %v1521_v2 = vld [vmem:[#allocation8] sm:$0xff]   ;;  %v1522_v3 = vld [vmem:[#allocation10 + $0x8] sm:$0xff]   ;;  %vm441_vm1 = vcmask 261120  }
  0xcc   : > { %1777 = vsyncadd (%p2342_p6), [#allocation12], 4294967040  ;;  %1351 = vmatprep.subr.bf16.mxu1 %v1806_v0  ;;  %1343 = vmatprep.subr.bf16.mxu0 %v1806_v0  ;;  %v411_v4 = vld [vmem:[%s347_s11] sm:$0xf]  ;;  %v1523_v5 = vld [vmem:[#allocation8 + $0x8] sm:$0xff]   ;;  %vm598_vm2 = vcmask 64512  }
  0xcd   : > { %1355 = vmatprep.mubr.msk.bf16.mxu1 %vm1807_vm0, %v1806_v0  ;;  %1347 = vmatprep.mubr.msk.bf16.mxu0 %vm1807_vm0, %v1806_v0  ;;  %v410_v6 = vld [vmem:[%s338_s12] sm:$0xf]  ;;  %s1808_s30 = smov 112   ;;  %s1809_s17 = smov 120   ;;  %v1524_v18 = vld [vmem:[%s2284_s5] sm:$0xff]   ;;  %v1525_v19 = vld [vmem:[%s2284_s5 + $0x8] sm:$0xff]  }
  0xce   : > { %1352 = vmatpush3.bf16.msra.mxu1 %v1520_v1  ;;  %1344 = vmatpush3.bf16.msra.mxu0 %v1521_v2  ;;  %s1810_s14 = smov 104   ;;  %v412_v20 = vld [vmem:[%s356_s27] sm:$0xf]  ;;  %vm661_vm3 = vcmask 1043456   ;;  %s1811_s13 = smov 8   ;;  %vm1054_vm4 = vcmask 130048  }
  0xcf   : > { %1353 = vmatprep.subr.bf16.mxu1 %v1806_v0  ;;  %1345 = vmatprep.subr.bf16.mxu0 %v1806_v0  ;;  %s1812_s24 = smov 16   ;;  %s1813_s21 = smov 24   ;;  %vm1056_vm5 = vcmask 195584  }
  0xd0   : > { %s1290_s29 = sshll.u32 %s2115_s19, 3  ;;  %s1312_s10 = sshll.u32 %s1876_s28, 7 }
  0xd1   : > { %s408_s15 = scalar_lea.vmem [#allocation13], %s1290_s29  ;;  %s2343_s12 = sld [smem:[#allocation26_spill]] }
  0xd2   : > { %1354 = vmatpush3.bf16.msra.mxu1 %v1522_v3  ;;  %1346 = vmatpush3.bf16.msra.mxu0 %v1523_v5  ;;  %s1129_s1 = sshll.u32 %s408_s15, 4  ;;  %s1116_s22 = scalar_lea.sflag [#allocation4], %s2115_s19  ;;  %s2236_s1 = int_to_ptr.vmem [resolvable:$true] %s1129_s1 }
  0xd3   : > { %1367 = vmatprep.subr.bf16.mxu1 %v1806_v0  ;;  %1359 = vmatprep.subr.bf16.mxu0 %v1806_v0  ;;  %s1718_s11 = scalar_lea.vmem %s2236_s1, 128  ;;  %p2344_p0 = scmp.ne.s32.totalorder %s2325_s20, 0 }
  0xd4   : > { %p1719_p10 = scmp.ne.s32.totalorder %s2236_s1, %s1718_s11  ;;  %s1814_s28 = smov [#allocation13]  }
  0xd5   : > { %1356 = vmatmul.mubr.msk.bf16.vlgmr.msra.gmra.mrb[0].mxu1 %vm441_vm1, %v411_v4  ;;  %1348 = vmatmul.mubr.msk.bf16.vlgmr.msra.gmra.mrb[0].mxu0 %vm441_vm1, %v410_v6  ;;  %s1722_s27 = sshll.u32 %s1814_s28, 4  ;;  %s1723_s27 = int_to_ptr.vmem [resolvable:$false] %s1722_s27 }
  0xd6   : > { %1369 = vmatprep.mubr.msk.bf16.mxu1 %vm1807_vm0, %v1806_v0  ;;  %1363 = vmatprep.mubr.msk.bf16.mxu0 %vm1807_vm0, %v1806_v0  ;;  %p1720_p4 = pnand %p1719_p10, %p2344_p0  ;;  %p1725_p13 = scmp.lt.s32.totalorder %s2236_s1, %s1723_s27 }
  0xd7   : > { %1360 = vmatpush3.bf16.msra.mxu0 %v1524_v18  ;;  %s2234_s9 = scalar_lea.hbm %s2343_s12, %s1312_s10 }
  0xd8   : > { %1361 = vmatprep.subr.bf16.mxu0 %v1806_v0  ;;  %p1721_p9 = pneg %p1720_p4 }
  0xdb   : > { %1362 = vmatpush3.bf16.msra.mxu0 %v1525_v19 }
  0xdc   : > { %1373 = vmatprep.subr.bf16.mxu0 %v1806_v0 }
  0xde   : > { %1364 = vmatmul.mubr.msk.bf16.vlgmr.msra.gmra.mrb[4].mxu0 %vm441_vm1, %v412_v20 }
  0xdf   : > { %1375 = vmatprep.mubr.msk.bf16.mxu0 %vm1807_vm0, %v1806_v0 }
 0x1a8   : > { %v535_v7 = vpop.f32.mrb[0].mxu1  ;;  %v479_v10 = vpop.f32.mrb[0].mxu0 }
 0x1a9   : > { %v541_v8 = vpack.c.bf16 %v535_v7, %v535_v7  ;;  %v1357_v9 = vpop.f32.mrb[1].mxu1  ;;  %v1349_v12 = vpop.f32.mrb[1].mxu0  ;;  %v485_v14 = vpack.c.bf16 %v479_v10, %v479_v10 }
 0x1aa   : > { %v538_v11 = vpop.f32.mrb[2].mxu1  ;;  %v482_v16 = vpop.f32.mrb[2].mxu0 }
 0x1ab   : > { %821 = vrot.lane.b32.xlu1 %v541_v8, %s1808_s30  ;;  %709 = vrot.lane.b32.xlu0 %v541_v8, %s1809_s17  ;;  %v1358_v13 = vpop.f32.mrb[3].mxu1  ;;  %v603_v15 = vsel %vm598_vm2, %v541_v8, 0  ;;  %v1350_v17 = vpop.f32.mrb[3].mxu0 }
 0x1ac   : > { %1368 = vmatpush3.bf16.xpose.msra.mxu1 %v603_v15 }
 0x1ad   : > { %1379 = vmatprep.subr.bf16.mxu1 %v1806_v0 }
 0x1af   : > { %819 = vrot.lane.b32.xlu1 %v485_v14, %s1808_s30  ;;  %706 = vrot.lane.b32.xlu0 %v485_v14, %s1809_s17 }
 0x1b1   : > { %v591_v36 = vpop.f32.mrb[4].mxu0 }
 0x1b2   : > { %v597_v37 = vpack.c.bf16 %v591_v36, %v591_v36  ;;  %v1365_v38 = vpop.f32.mrb[5].mxu0 }
 0x1b3   : > { %930 = vrot.lane.b32.xlu1 %v485_v14, %s1810_s14  ;;  %932 = vrot.lane.b32.xlu0 %v541_v8, %s1810_s14  ;;  %v594_v39 = vpop.f32.mrb[6].mxu0 }
 0x1b4   : > { %1370 = vmatmul.mubr.msk.bf16.vlgmr.msra.gmra.mrb[4].mxu1 %vm598_vm2, %v485_v14  ;;  %v1366_v40 = vpop.f32.mrb[7].mxu0  ;;  %v663_v41 = vsel %vm661_vm3, %v597_v37, 0 }
 0x1b5   : > { %1381 = vmatprep.mubr.msk.bf16.mxu1 %vm1807_vm0, %v1806_v0  ;;  %1374 = vmatpush3.bf16.msra.mxu0 %v663_v41 }
 0x1b6   : > { %1385 = vmatprep.subr.bf16.mxu0 %v1806_v0 }
 0x21d   : > { %v710_v21 = vpop.permute.xlu0 %709  ;;  %v822_v23 = vpop.permute.xlu1 %821 }
 0x21e   : > { %v715_v22 = vsel %vm598_vm2, %v710_v21, 0  ;;  %v827_v25 = vsel %vm598_vm2, %v822_v23, 0 }
 0x21f   : > { %1380 = vmatpush3.bf16.xpose.msra.mxu1 %v715_v22 }
 0x220   : > { %1391 = vmatprep.subr.bf16.mxu1 %v1806_v0 }
 0x221   : > { %v707_v24 = vpop.permute.xlu0 %706  ;;  %v820_v27 = vpop.permute.xlu1 %819 }
 0x225   : > { %v933_v26 = vpop.permute.xlu0 %932  ;;  %v931_v29 = vpop.permute.xlu1 %930 }
 0x226   : > { %1382 = vmatmul.mubr.msk.bf16.vlgmr.msra.gmra.mrb[8].mxu1 %vm598_vm2, %v707_v24  ;;  %v938_v28 = vsel %vm598_vm2, %v933_v26, 0 }
 0x227   : > { %1392 = vmatpush3.bf16.xpose.msra.mxu1 %v827_v25  ;;  %1393 = vmatprep.mubr.msk.bf16.mxu1 %vm1807_vm0, %v1806_v0 }
 0x228   : > { %1403 = vmatprep.subr.bf16.mxu1 %v1806_v0 }
 0x22e   : > { %1394 = vmatmul.mubr.msk.bf16.vlgmr.msra.gmra.mrb[12].mxu1 %vm598_vm2, %v820_v27 }
 0x22f   : > { %1404 = vmatpush3.bf16.xpose.msra.mxu1 %v938_v28  ;;  %1405 = vmatprep.mubr.msk.bf16.mxu1 %vm1807_vm0, %v1806_v0 }
 0x230   : > { %1415 = vmatprep.subr.bf16.mxu1 %v1806_v0 }
 0x236   : > { %1406 = vmatmul.mubr.msk.bf16.vlgmr.msra.gmra.mrb[16].mxu1 %vm598_vm2, %v931_v29 }
 0x237   : > { %1419 = vmatprep.mubr.msk.bf16.mxu1 %vm1807_vm0, %v1806_v0 }
 0x287   : > { %v639_v30 = vpop.f32.mrb[4].mxu1 }
 0x288   : > { %v645_v31 = vmul.f32 0.35355338, %v639_v30  ;;  %v1371_v32 = vpop.f32.mrb[5].mxu1 }
 0x289   : > { %v642_v33 = vpop.f32.mrb[6].mxu1 }
 0x28a   : > { %v1372_v34 = vpop.f32.mrb[7].mxu1  ;;  %v646_v35 = vsel %vm598_vm2, %v645_v31, -inf }
 0x28b   : > { %647 = vmax.xlane.f32.xlu0 %v646_v35 }
 0x2f9   : > { %v751_v42 = vpop.f32.mrb[8].mxu1 }
 0x2fa   : > { %v757_v43 = vmul.f32 0.35355338, %v751_v42  ;;  %v1383_v44 = vpop.f32.mrb[9].mxu1 }
 0x2fb   : > { %v754_v45 = vpop.f32.mrb[10].mxu1 }
 0x2fc   : > { %v1384_v46 = vpop.f32.mrb[11].mxu1  ;;  %v758_v47 = vsel %vm598_vm2, %v757_v43, -inf }
 0x2fd   : > { %759 = vmax.xlane.f32.xlu1 %v758_v47 }
 0x301   : > { %v863_v48 = vpop.f32.mrb[12].mxu1 }
 0x302   : > { %v869_v49 = vmul.f32 0.35355338, %v863_v48  ;;  %v1395_v50 = vpop.f32.mrb[13].mxu1  ;;  %v1527_v48 = vld [vmem:[#allocation11 + $0x8] sm:$0xff]  }
 0x303   : > { %v866_v51 = vpop.f32.mrb[14].mxu1 }
 0x304   : > { %v1396_v52 = vpop.f32.mrb[15].mxu1  ;;  %v870_v53 = vsel %vm598_vm2, %v869_v49, -inf }
 0x305   : > { %871 = vmax.xlane.f32.xlu0 %v870_v53 }
 0x309   : > { %v974_v54 = vpop.f32.mrb[16].mxu1 }
 0x30a   : > { %v980_v55 = vmul.f32 0.35355338, %v974_v54  ;;  %v1407_v56 = vpop.f32.mrb[17].mxu1 }
 0x30b   : > { %v977_v57 = vpop.f32.mrb[18].mxu1 }
 0x30c   : > { %v1408_v58 = vpop.f32.mrb[19].mxu1  ;;  %v981_v59 = vsel %vm598_vm2, %v980_v55, -inf }
 0x30d   : > { %982 = vmax.xlane.f32.xlu0 %v981_v59 }
 0x318   : > { %v648_v60 = vpop.xlane.xlu0 %647 }
 0x319   : > { %v649_v61 = vsub.f32 %v645_v31, %v648_v60 }
 0x31b   : > { %v650_v62 = vmul.f32 1.442695, %v649_v61 }
 0x31d   : > { %1528 = vpow2.f32 %v650_v62 }
 0x327   : > { %v1529_v63 = vpop.eup %1528 }
 0x328   : > { %v652_v1 = vsel %vm598_vm2, %v1529_v63, 0.0 }
 0x329   : > { %653 = vadd.xlane.f32.xlu1 %v652_v1 }
 0x33a   : > { %771 = vrot.lane.b32.xlu1 %v597_v37, %s1809_s17 }
 0x38a   : > { %v760_v2 = vpop.xlane.xlu1 %759 }
 0x38b   : > { %v761_v3 = vsub.f32 %v757_v43, %v760_v2  ;;  %v1526_v43 = vld [vmem:[#allocation11] sm:$0xff]  }
 0x38c   : > { %1416 = vmatpush3.bf16.msra.mxu1 %v1526_v43 }
 0x38d   : > { %v762_v4 = vmul.f32 1.442695, %v761_v3  ;;  %1417 = vmatprep.subr.bf16.mxu1 %v1806_v0 }
 0x38f   : > { %1530 = vpow2.f32 %v762_v4 }
 0x390   : > { %1418 = vmatpush3.bf16.msra.mxu1 %v1527_v48 }
 0x392   : > { %v872_v5 = vpop.xlane.xlu0 %871 }
 0x393   : > { %v873_v6 = vsub.f32 %v869_v49, %v872_v5 }
 0x395   : > { %v874_v7 = vmul.f32 1.442695, %v873_v6 }
 0x397   : > { %1532 = vpow2.f32 %v874_v7 }
 0x399   : > { %v1531_v8 = vpop.eup %1530 }
 0x39a   : > { %v983_v9 = vpop.xlane.xlu0 %982  ;;  %v764_v10 = vsel %vm598_vm2, %v1531_v8, 0.0 }
 0x39b   : > { %v984_v11 = vsub.f32 %v980_v55, %v983_v9  ;;  %765 = vadd.xlane.f32.xlu0 %v764_v10 }
 0x39d   : > { %v985_v12 = vmul.f32 1.442695, %v984_v11 }
 0x39f   : > { %1534 = vpow2.f32 %v985_v12 }
 0x3a1   : > { %v1533_v13 = vpop.eup %1532 }
 0x3a2   : > { %v876_v14 = vsel %vm598_vm2, %v1533_v13, 0.0 }
 0x3a3   : > { %877 = vadd.xlane.f32.xlu1 %v876_v14 }
 0x3a9   : > { %v1535_v15 = vpop.eup %1534 }
 0x3aa   : > { %v987_v16 = vsel %vm598_vm2, %v1535_v15, 0.0 }
 0x3ab   : > { %988 = vadd.xlane.f32.xlu0 %v987_v16 }
 0x3b4   : > { %993 = vrot.lane.b32.xlu1 %v597_v37, %s1810_s14 }
 0x3b6   : > { %v654_v17 = vpop.xlane.xlu1 %653 }
 0x3b7   : > { %1536 = vrcp.f32 %v654_v17 }
 0x3ba   : > { %v772_v19 = vpop.permute.xlu1 %771 }
 0x3bb   : > { %v777_v22 = vsel %vm661_vm3, %v772_v19, 0 }
 0x3c1   : > { %v1537_v18 = vpop.eup %1536  ;;  %882 = vrot.lane.b32.xlu0 %v597_v37, %s1808_s30  ;;  %s1724_s30 = scalar_lea.vmem %s1723_s27, 256 }
 0x3c2   : > { %v656_v20 = vmul.f32 %v1537_v18, %v1529_v63  ;;  %p1726_p7 = scmp.lt.s32.totalorder %s1724_s30, %s1718_s11 }
 0x3c4   : > { %v657_v21 = vpack.c.bf16 %v656_v20, %v656_v20  ;;  %p1727_p3 = por %p1726_p7, %p1725_p13 }
 0x3c6   : > { %1376 = vmatmul.mubr.msk.bf16.vlgmr.msra.gmra.mrb[8].mxu0 %vm598_vm2, %v657_v21  ;;  %p1728_p5 = pnand %p1727_p3, %p1721_p9 }
 0x3c7   : > { %1386 = vmatpush3.bf16.msra.mxu0 %v777_v22  ;;  %1387 = vmatprep.mubr.msk.bf16.mxu0 %vm1807_vm0, %v1806_v0 }
 0x3c8   : > { %1397 = vmatprep.subr.bf16.mxu0 %v1806_v0 }
 0x428   : > { %v766_v23 = vpop.xlane.xlu0 %765 }
 0x429   : > { %1538 = vrcp.f32 %v766_v23 }
 0x430   : > { %v878_v24 = vpop.xlane.xlu1 %877 }
 0x431   : > { %1540 = vrcp.f32 %v878_v24 }
 0x433   : > { %v1539_v25 = vpop.eup %1538 }
 0x434   : > { %v768_v26 = vmul.f32 %v1539_v25, %v1531_v8  ;;  %v994_v33 = vpop.permute.xlu1 %993 }
 0x435   : > { %v999_v35 = vsel %vm661_vm3, %v994_v33, 0 }
 0x436   : > { %v769_v27 = vpack.c.bf16 %v768_v26, %v768_v26 }
 0x438   : > { %v989_v28 = vpop.xlane.xlu0 %988  ;;  %1388 = vmatmul.mubr.msk.bf16.vlgmr.msra.gmra.mrb[12].mxu0 %vm598_vm2, %v769_v27 }
 0x439   : > { %1542 = vrcp.f32 %v989_v28  ;;  %1399 = vmatprep.mubr.msk.bf16.mxu0 %vm1807_vm0, %v1806_v0 }
 0x43b   : > { %v1541_v29 = vpop.eup %1540 }
 0x43c   : > { %v880_v30 = vmul.f32 %v1541_v29, %v1533_v13  ;;  %v883_v31 = vpop.permute.xlu0 %882 }
 0x43d   : > { %v888_v32 = vsel %vm661_vm3, %v883_v31, 0 }
 0x43e   : > { %1398 = vmatpush3.bf16.msra.mxu0 %v888_v32  ;;  %v881_v34 = vpack.c.bf16 %v880_v30, %v880_v30 }
 0x43f   : > { %1409 = vmatprep.subr.bf16.mxu0 %v1806_v0 }
 0x441   : > { %1400 = vmatmul.mubr.msk.bf16.vlgmr.msra.gmra.mrb[16].mxu0 %vm598_vm2, %v881_v34 }
 0x442   : > { %1410 = vmatpush3.bf16.msra.mxu0 %v999_v35  ;;  %1411 = vmatprep.mubr.msk.bf16.mxu0 %vm1807_vm0, %v1806_v0 }
 0x443   : > { %v1543_v36 = vpop.eup %1542 }
 0x444   : > { %v991_v37 = vmul.f32 %v1543_v36, %v1535_v15 }
 0x446   : > { %v992_v38 = vpack.c.bf16 %v991_v37, %v991_v37 }
 0x449   : > { %1412 = vmatmul.mubr.msk.bf16.vlgmr.msra.gmra.mrb[20].mxu0 %vm598_vm2, %v992_v38 }
 0x499   : > { %v699_v39 = vpop.f32.mrb[8].mxu0 }
 0x49a   : > { %v1377_v40 = vpop.f32.mrb[9].mxu0 }
 0x49b   : > { %v702_v41 = vpop.f32.mrb[10].mxu0 }
 0x49c   : > { %v1378_v42 = vpop.f32.mrb[11].mxu0 }
 0x50b   : > { %v813_v44 = vpop.f32.mrb[12].mxu0 }
 0x50c   : > { %1042 = vrot.lane.b32.xlu1 %v813_v44, %s1811_s13  ;;  %v1389_v45 = vpop.f32.mrb[13].mxu0 }
 0x50d   : > { %v816_v46 = vpop.f32.mrb[14].mxu0 }
 0x50e   : > { %v1390_v47 = vpop.f32.mrb[15].mxu0 }
 0x514   : > { %v924_v49 = vpop.f32.mrb[16].mxu0 }
 0x515   : > { %1046 = vrot.lane.b32.xlu0 %v924_v49, %s1812_s24  ;;  %v1401_v50 = vpop.f32.mrb[17].mxu0 }
 0x516   : > { %v927_v51 = vpop.f32.mrb[18].mxu0 }
 0x517   : > { %v1402_v52 = vpop.f32.mrb[19].mxu0 }
 0x51c   : > { %v1035_v53 = vpop.f32.mrb[20].mxu0 }
 0x51d   : > { %1050 = vrot.lane.b32.xlu1 %v1035_v53, %s1813_s21  ;;  %v1413_v54 = vpop.f32.mrb[21].mxu0 }
 0x51e   : > { %v1038_v0 = vpop.f32.mrb[22].mxu0 }
 0x51f   : > { %v1414_v55 = vpop.f32.mrb[23].mxu0 }
 0x57e   : > { %v1043_v56 = vpop.permute.xlu1 %1042 }
 0x57f   : > { %v1053_v58 = vsel %vm598_vm2, %v699_v39, %v1043_v56 }
 0x587   : > { %v1047_v57 = vpop.permute.xlu0 %1046 }
 0x588   : > { %v1055_v59 = vsel %vm1054_vm4, %v1053_v58, %v1047_v57 }
 0x58f   : > { %v1051_v60 = vpop.permute.xlu1 %1050 }
 0x590   : > { %v1057_v61 = vsel %vm1056_vm5, %v1055_v59, %v1051_v60 }
 0x591   : > { %v1058_v62 = vpack.c.bf16 %v1057_v61, %v1057_v61 }
 0x593   : > { %1420 = vmatmul.mubr.msk.bf16.vlgmr.msra.gmra.mrb[20].mxu1 %vm441_vm1, %v1058_v62 }
 0x666   : > { %v1108_v63 = vpop.f32.mrb[20].mxu1 }
 0x667   : > { %1114 = vst.msk [vmem:[%s408_s15] sm:$0xff] %vm441_vm1, %v1108_v63  ;;  %v1421_v1 = vpop.f32.mrb[21].mxu1 }
 0x668   : > { %v1111_v2 = vpop.f32.mrb[22].mxu1 }
 0x669   : > { %1731 = shalt.err (!%p1728_p5)
}
 0x66a   : > { %s1732_s19 = scalar_lea.hbm %s2234_s9, 128  ;;  %s1736_s16 = scalar_lea.hbm %s2343_s12, 256 }
 0x66b   : > { %p1733_p2 = scmp.ne.s32.totalorder %s2234_s9, %s1732_s19  ;;  %p1737_p12 = scmp.lt.u32.totalorder %s2234_s9, %s2343_s12 }
 0x66c   : > { %p1738_p1 = scmp.lt.u32.totalorder %s1736_s16, %s1732_s19  ;;  %p1740_p10 = scmp.lt.u32.totalorder %s1732_s19, %s2234_s9 }
 0x66d   : > { %p1734_p8 = pnand %p1733_p2, %p2344_p0 }
 0x66e   : > { %p1739_p6 = por %p1738_p1, %p1737_p12 }
 0x66f   : > { %p1735_p11 = pneg %p1734_p8 }
 0x670   : > { %p1741_p4 = por %p1740_p10, %p1739_p6 }
 0x672   : > { %p1742_p9 = pnand %p1741_p4, %p1735_p11 }
 0x674   : > { %1745 = shalt.err (!%p1742_p9)
}
 0x675   : > { %1441 = dma.vmem_to_hbm [thread:$0]  (%p2344_p0), %s2236_s1, 128, %s2234_s9, %s1116_s22   ;;  %v1422_v3 = vpop.f32.mrb[23].mxu1 }
 0x676 PF: > { %s2345_s7 = sld [smem:[#allocation19_spill]]  ;;  %s2346_s13 = sld [smem:[#allocation21_spill]] }
 0x677   : > { %s2347_s24 = sld [smem:[#allocation20_spill]] }
 0x67c   : > { %s1141_s21 = sand.u32 1, %s2345_s7   ;;  %p2348_p13 = scmp.ne.s32.totalorder %s2346_s13, 0 }
 0x67d   : > { %p2349_p7 = scmp.ge.s32.totalorder %s2347_s24, 2  ;;  %s1142_s29 = scalar_lea.sflag [#allocation4], %s1141_s21 }
 0x67f   : > { %p1464_p3 = pnand %p2349_p7, %p2348_p13 }
 0x681   : > { %1779 = dma.done.wait (!%p1464_p3), %s1142_s29, 128  }
 0x682   : > { %1781 = vsyncadd (!%p1464_p3), %s1142_s29, 4294967168  ;;  %s2350_s27 = sld [smem:[#allocation22_spill]]  ;;  %s2351_s10 = sld [smem:[#allocation23_spill]] }
 0x683   : > { %s2352_s24 = smov %s1788_s25  ;;  %s2353_s25 = smov %s1792_s26 }
 0x688   : > { %p25_p5 = scmp.ge.s32.totalorder %s2350_s27, 4   ;;  %s2354_s26 = smov %s2351_s10 }
 0x68a   :  { %27 = sbr.rel (!%p25_p5) target bundleno = 13 (0xd), region = 129 }
 0x691   :  { %1147 = vsyncpa [#allocation3], 1 }
 0x692   :  { %1149 = vsyncpa [#allocation3 + $0x1], 1 }
 0x693   :  { %1150 = vsyncpa [#allocation6], 1 }
 0x694   :  { %1152 = vsyncpa [#allocation6 + $0x1], 1 }
 0x695   :  { %1153 = vsyncpa [#allocation9], 1 }
 0x696   :  { %1154 = vsyncpa [#allocation12], 1 }
 0x697   :  { %1155 = vsyncpa [#allocation4], 1 }
 0x698   :  { %1157 = vsyncpa [#allocation4 + $0x1], 1 }

</bundles_post_ra>
